<compile_context>
chip_gen: v7x
topology: tpu7x:2x2x1
jax: 0.10.0
libtpu: 0.0.40
codegen_flags: <defaults>
</compile_context>

<pallas_src>
import functools

import jax
import jax.numpy as jnp
from jax.experimental import pallas as pl
from jax.experimental.pallas import tpu as pltpu

LANES = 128
_SUBLANES = 8
_NEG_BIG = -1e30                       # additive mask for padded cluster lanes
_VMEM_LIMIT_BYTES = 48 * 1024 * 1024   # safe on v5e/v6e (128 MiB) and v7x (64 MiB)
_VMEM_BUDGET_BYTES = 36 * 1024 * 1024  # target for tile sizing (leaves headroom)


def _round_up(n, m):
    return ((n + m - 1) // m) * m


def _default_bf16_exp():
    """bf16 EUP exists on v6e/v7x; not on <= v5.  f32 fallback on lookup failure."""
    try:
        kind = jax.devices()[0].device_kind.lower()
    except Exception:
        return False
    return not any(v in kind for v in ("v2", "v3", "v4", "v5"))


def _vlad_bow_kernel(x_ref, w_ref, b_ref, mask_ref, o_ref, *,
                     power, n_clusters, n_frames, bf16_exp):
    # x_ref:    (Bb, Tt, F)  original input dtype (cast to bf16 in-kernel)
    # w_ref:    (F, Cp)      bf16, zero in padded cluster columns
    # b_ref:    (1, Cp)      f32,  zero in padded cluster lanes
    # mask_ref: (1, Cp)      f32 additive mask: 0 real clusters, -1e30 padded
    # o_ref:    (Bb, Cp)     f32 accumulator, resident across the frame grid axis
    bb, tt, f = x_ref.shape
    cp = w_ref.shape[1]
    t_idx = pl.program_id(1)

    # (Bb*Tt, F) bf16 @ (F, Cp) bf16 -> f32 MXU accumulation.  The bf16 cast of
    # x here is free VALU filler (EUP/softmax dominates); reshape is layout
    # clean when Tt % 8 == 0 (or Tt == T) and F % 128 == 0.
    x2d = x_ref[...].reshape(bb * tt, f).astype(jnp.bfloat16)
    logits = jnp.dot(x2d, w_ref[...], preferred_element_type=jnp.float32)
    logits = logits + b_ref[...]                                 # f32 bias

    if power is not None:
        # Integer powers lower to VALU multiplies; float powers go through
        # pow = exp(log) and double the load on the (binding) EUP slot.
        logits = logits ** power

    if n_clusters != cp:
        if power is None or (isinstance(power, (int, float)) and power > 0):
            # Cheap path: one broadcast add.  Padded lanes have logit exactly 0
            # (zero weight column + zero bias), so 0**p stays 0 for p > 0 and
            # the -1e30 mask wins after the power op.
            logits = logits + mask_ref[...]
        else:
            # Corner case (power <= 0): 0**power may be inf/nan; hard-select.
            lane = jax.lax.broadcasted_iota(jnp.int32, logits.shape, 1)
            logits = jnp.where(lane < n_clusters, logits, _NEG_BIG)

    # Numerically stable softmax over clusters (lane axis).
    m = jnp.max(logits, axis=-1, keepdims=True)
    shifted = logits - m
    if bf16_exp:
        # bf16 exp on v6e/v7x ~doubles EUP throughput and halves the largest
        # intermediate; reductions and the frame sum stay in f32.
        e = jnp.exp(shifted.astype(jnp.bfloat16)).astype(jnp.float32)
    else:
        e = jnp.exp(shifted)
    denom = jnp.sum(e, axis=-1, keepdims=True)
    soft = e * pl.reciprocal(denom, approx=True)                 # EUP vrcp
    # TODO(synk): if a bundle dump shows XLU (not EUP) binding for large Cp,
    # offload the lane-sum denominator to the idle MXU via a ones-column dot.

    if n_frames % tt != 0:
        # Partial last frame tile: zero contributions from out-of-range frames
        # (their rows hold garbage from the out-of-bounds block read).
        row = jax.lax.broadcasted_iota(jnp.int32, (bb * tt, 1), 0)
        frame = t_idx * tt + row % tt
        soft = jnp.where(frame < n_frames, soft, 0.0)

    part = jnp.sum(soft.reshape(bb, tt, cp), axis=1)             # (Bb, Cp) f32

    # Accumulate over the (arbitrary, innermost) frame axis into the resident
    # f32 output block.
    @pl.when(t_idx == 0)
    def _():
        o_ref[...] = part

    @pl.when(t_idx != 0)
    def _():
        o_ref[...] = o_ref[...] + part


def prepare_vlad_params(w_assign, b_assign):
    """One-time parameter prep (hoisted out of the per-call path).

    w_assign: (C, F) torch-layout Linear weight; b_assign: (C,).
    Returns (w_t, b2d, mask2d, n_clusters): weight transposed to (F, Cp) bf16
    with the cluster dim zero-padded to a multiple of 128 lanes, f32 bias
    (zero in padded lanes) and an f32 additive lane mask (0 real / -1e30 pad).
    """
    C, F = w_assign.shape
    Cp = _round_up(C, LANES)
    w_t = jnp.zeros((F, Cp), jnp.bfloat16)
    w_t = w_t.at[:, :C].set(
        jnp.asarray(w_assign, jnp.float32).T.astype(jnp.bfloat16))
    b2d = jnp.zeros((1, Cp), jnp.float32)
    b2d = b2d.at[:, :C].set(jnp.asarray(b_assign, jnp.float32))
    lane = jnp.arange(Cp)[None, :]
    mask2d = jnp.where(lane < C, 0.0, _NEG_BIG).astype(jnp.float32)
    return w_t, b2d, mask2d, C


def _estimate_vmem_bytes(bb, tt, f, cp, x_bytes, bf16_exp):
    x_blk = 2 * bb * tt * f * x_bytes            # double-buffered x tile
    w_blk = 2 * f * cp * 2                       # bf16 weights (constant block)
    o_blk = 2 * bb * cp * 4                      # f32 output block
    vecs = 4 * cp * 4                            # bias + mask
    e_bytes = 2 if bf16_exp else 4
    inter = bb * tt * cp * (4 + 4 + e_bytes)     # logits + soft (f32) + e
    return x_blk + w_blk + o_blk + vecs + inter + (1 << 20)


def _choose_tiles(B, T, F, Cp, x_bytes, bf16_exp, block_b):
    Bb = min(_round_up(block_b, _SUBLANES), _round_up(B, _SUBLANES))
    # v7x megacore: ensure >= 2 "parallel" batch blocks whenever B allows it so
    # both TensorCores get work (v5e/v6e are single-TC and unaffected).
    if B > _SUBLANES:
        Bb = min(Bb, max(_SUBLANES, _round_up((B + 1) // 2, _SUBLANES)))
    # Tile the frame axis so per-step live intermediates fit the VMEM budget
    # (v7x only has 64 MiB of VMEM per TensorCore, 32 MiB scoped by default).
    Tt = T
    if _estimate_vmem_bytes(Bb, Tt, F, Cp, x_bytes, bf16_exp) > _VMEM_BUDGET_BYTES:
        Tt = max(_SUBLANES, (T // _SUBLANES) * _SUBLANES)
        while Tt > _SUBLANES and _estimate_vmem_bytes(
                Bb, Tt, F, Cp, x_bytes, bf16_exp) > _VMEM_BUDGET_BYTES:
            Tt -= _SUBLANES
        while Bb > _SUBLANES and _estimate_vmem_bytes(
                Bb, Tt, F, Cp, x_bytes, bf16_exp) > _VMEM_BUDGET_BYTES:
            Bb -= _SUBLANES
    return Bb, Tt


def vlad_bow(x, w_t, b2d, mask2d, n_clusters, *, power=None, block_b=32,
             bf16_exp=None):
    """x: (B, T, F); (w_t, b2d, mask2d, n_clusters) from prepare_vlad_params()."""
    B, T, F = x.shape
    Cp = w_t.shape[1]
    if bf16_exp is None:
        bf16_exp = _default_bf16_exp()

    x_bytes = jnp.dtype(x.dtype).itemsize
    Bb, Tt = _choose_tiles(B, T, F, Cp, x_bytes, bf16_exp, block_b)
    num_b = pl.cdiv(B, Bb)   # partial last batch block: garbage rows are
                             # row-independent and dropped on writeback
    num_t = pl.cdiv(T, Tt)   # partial last frame tile masked in-kernel

    kernel = functools.partial(_vlad_bow_kernel, power=power,
                               n_clusters=n_clusters, n_frames=T,
                               bf16_exp=bf16_exp)
    cost = pl.CostEstimate(
        flops=2 * B * T * F * Cp + 8 * B * T * Cp,
        transcendentals=B * T * Cp,
        bytes_accessed=B * T * F * x_bytes + F * Cp * 2 + B * Cp * 4)

    out = pl.pallas_call(
        kernel,
        out_shape=jax.ShapeDtypeStruct((B, Cp), jnp.float32),
        grid=(num_b, num_t),
        in_specs=[
            pl.BlockSpec((Bb, Tt, F), lambda b, t: (b, t, 0)),   # x (orig dtype)
            pl.BlockSpec((F, Cp), lambda b, t: (0, 0)),          # weights (bf16)
            pl.BlockSpec((1, Cp), lambda b, t: (0, 0)),          # bias (f32)
            pl.BlockSpec((1, Cp), lambda b, t: (0, 0)),          # lane mask (f32)
        ],
        out_specs=pl.BlockSpec((Bb, Cp), lambda b, t: (b, 0)),
        compiler_params=pltpu.CompilerParams(
            dimension_semantics=("parallel", "arbitrary"),
            vmem_limit_bytes=_VMEM_LIMIT_BYTES),
        cost_estimate=cost,
    )(x, w_t, b2d, mask2d)
    return out[:, :n_clusters] if n_clusters != Cp else out


def vlad_bow_ref(x, w_assign, b_assign, *, power=None):
    logits = jnp.einsum("btf,cf->btc", x, w_assign) + b_assign
    if power is not None:
        logits = logits ** power
    soft = jax.nn.softmax(logits, axis=-1)
    return soft.sum(axis=1)


if __name__ == "__main__":
    key = jax.random.PRNGKey(0)
    B, T, F, C = 2, 8, 32, 16   # batch, n_frames, input_n_features, n_clusters

    k_x, k_w, k_b, k_cc = jax.random.split(key, 4)
    x = jax.random.normal(k_x, (B, T, F), dtype=jnp.float32)

    # nn.Linear(input_n_features, n_clusters): weight (C, F), bias (C,)
    bound = 1.0 / jnp.sqrt(jnp.float32(F))
    w_assign = jax.random.uniform(k_w, (C, F), jnp.float32, -bound, bound)
    b_assign = jax.random.uniform(k_b, (C,), jnp.float32, -bound, bound)
    # cluster_centers exists in __init__ but is unused by forward; keep parity.
    cluster_centers = jax.random.uniform(
        k_cc, (C, F), jnp.float32,
        -jnp.sqrt(6.0 / (C + F)), jnp.sqrt(6.0 / (C + F)))
    del cluster_centers

    # One-time parameter preparation (transpose / pad / cast / mask hoisted).
    w_t, b2d, mask2d, n_clusters = prepare_vlad_params(w_assign, b_assign)

    # power=None path
    out = jax.block_until_ready(vlad_bow(x, w_t, b2d, mask2d, n_clusters))
    ref = vlad_bow_ref(x, w_assign, b_assign, power=None)
    assert out.shape == (B, C)
    # bf16 matmul operands + (v6e/v7x) bf16 exp + approx reciprocal -> relaxed
    # tolerance vs. the f32 reference.
    assert jnp.allclose(out, ref, atol=2e-2, rtol=2e-2), (out, ref)

    # integer power path (exercises the precomputed additive lane mask)
    out_p = jax.block_until_ready(
        vlad_bow(x, w_t, b2d, mask2d, n_clusters, power=2))
    ref_p = vlad_bow_ref(x, w_assign, b_assign, power=2)
    assert jnp.allclose(out_p, ref_p, atol=2e-2, rtol=2e-2), (out_p, ref_p)

    print("KERNEL_OK")
</pallas_src>

<mosaic_0001>
module attributes {stable_mosaic.version = 11 : i64} {
  func.func @_vlad_bow_kernel(%arg0: i32, %arg1: i32, %arg2: memref<8x8x32xf32, #tpu.memory_space<vmem>>, %arg3: memref<32x128xbf16, #tpu.memory_space<vmem>>, %arg4: memref<1x128xf32, #tpu.memory_space<vmem>>, %arg5: memref<1x128xf32, #tpu.memory_space<vmem>>, %arg6: memref<8x128xf32, #tpu.memory_space<vmem>>) attributes {dimension_semantics = [#tpu.dimension_semantics<parallel>, #tpu.dimension_semantics<arbitrary>], iteration_bounds = array<i64: 1, 1>, scalar_prefetch = 0 : i64, scratch_operands = 0 : i64, tpu.core_type = #tpu.core_type<tc>, window_params = [{transform_indices = @transform_0, window_bounds = array<i64: 8, 8, 32>}, {pipeline_mode = #tpu.pipeline_mode<synchronous>, transform_indices = @transform_1, window_bounds = array<i64: 32, 128>}, {pipeline_mode = #tpu.pipeline_mode<synchronous>, transform_indices = @transform_2, window_bounds = array<i64: 1, 128>}, {pipeline_mode = #tpu.pipeline_mode<synchronous>, transform_indices = @transform_3, window_bounds = array<i64: 1, 128>}, {transform_indices = @transform_4, window_bounds = array<i64: 8, 128>}]} {
    %c0 = arith.constant 0 : index
    %c0_0 = arith.constant 0 : index
    %c0_1 = arith.constant 0 : index
    %0 = vector.load %arg2[%c0, %c0_0, %c0_1] : memref<8x8x32xf32, #tpu.memory_space<vmem>>, vector<8x8x32xf32>
    %1 = vector.shape_cast %0 : vector<8x8x32xf32> to vector<64x32xf32>
    %2 = arith.truncf %1 : vector<64x32xf32> to vector<64x32xbf16>
    %c0_2 = arith.constant 0 : index
    %c0_3 = arith.constant 0 : index
    %3 = vector.load %arg3[%c0_2, %c0_3] : memref<32x128xbf16, #tpu.memory_space<vmem>>, vector<32x128xbf16>
    %cst = arith.constant dense<0.000000e+00> : vector<64x128xf32>
    %4 = tpu.matmul %2, %3, %cst {dimension_numbers = #tpu.dot_dimension_numbers<[1], [0], [0], [1], [0, 0, 1, 1], [], []>} : vector<64x32xbf16>, vector<32x128xbf16>, vector<64x128xf32> -> vector<64x128xf32>
    %c0_4 = arith.constant 0 : index
    %c0_5 = arith.constant 0 : index
    %5 = vector.load %arg4[%c0_4, %c0_5] : memref<1x128xf32, #tpu.memory_space<vmem>>, vector<1x128xf32>
    %6 = vector.broadcast %5 : vector<1x128xf32> to vector<64x128xf32>
    %7 = arith.addf %4, %6 : vector<64x128xf32>
    %c0_6 = arith.constant 0 : index
    %c0_7 = arith.constant 0 : index
    %8 = vector.load %arg5[%c0_6, %c0_7] : memref<1x128xf32, #tpu.memory_space<vmem>>, vector<1x128xf32>
    %9 = vector.broadcast %8 : vector<1x128xf32> to vector<64x128xf32>
    %10 = arith.addf %7, %9 : vector<64x128xf32>
    %cst_8 = arith.constant dense<0xFF800000> : vector<64xf32>
    %11 = vector.multi_reduction <maximumf>, %10, %cst_8 [1] : vector<64x128xf32> to vector<64xf32>
    %12 = vector.shape_cast %11 : vector<64xf32> to vector<64x1xf32>
    %13 = vector.broadcast %12 : vector<64x1xf32> to vector<64x128xf32>
    %14 = arith.subf %10, %13 : vector<64x128xf32>
    %15 = arith.truncf %14 : vector<64x128xf32> to vector<64x128xbf16>
    %16 = math.exp %15 : vector<64x128xbf16>
    %17 = arith.extf %16 : vector<64x128xbf16> to vector<64x128xf32>
    %cst_9 = arith.constant dense<0.000000e+00> : vector<64xf32>
    %18 = vector.multi_reduction <add>, %17, %cst_9 [1] : vector<64x128xf32> to vector<64xf32>
    %19 = vector.shape_cast %18 : vector<64xf32> to vector<64x1xf32>
    %20 = tpu.reciprocal %19 {approx = true} : vector<64x1xf32> -> vector<64x1xf32>
    %21 = vector.broadcast %20 : vector<64x1xf32> to vector<64x128xf32>
    %22 = arith.mulf %17, %21 : vector<64x128xf32>
    %23 = vector.shape_cast %22 : vector<64x128xf32> to vector<8x8x128xf32>
    %cst_10 = arith.constant dense<0.000000e+00> : vector<8x128xf32>
    %24 = vector.multi_reduction <add>, %23, %cst_10 [1] : vector<8x8x128xf32> to vector<8x128xf32>
    %c0_i32 = arith.constant 0 : i32
    %25 = arith.cmpi eq, %arg1, %c0_i32 : i32
    %26 = arith.extui %25 : i1 to i32
    %c0_i32_11 = arith.constant 0 : i32
    %27 = arith.cmpi ne, %26, %c0_i32_11 : i32
    scf.if %27 {
      %c0_14 = arith.constant 0 : index
      %c0_15 = arith.constant 0 : index
      %31 = vector.load %arg6[%c0_14, %c0_15] : memref<8x128xf32, #tpu.memory_space<vmem>>, vector<8x128xf32>
      tpu.vector_store %arg6[%c0_14, %c0_15], %24 {strides = array<i32>} : memref<8x128xf32, #tpu.memory_space<vmem>>, vector<8x128xf32>,
    } else {
    }
    %c0_i32_12 = arith.constant 0 : i32
    %28 = arith.cmpi ne, %arg1, %c0_i32_12 : i32
    %29 = arith.extui %28 : i1 to i32
    %c0_i32_13 = arith.constant 0 : i32
    %30 = arith.cmpi ne, %29, %c0_i32_13 : i32
    scf.if %30 {
      %c0_14 = arith.constant 0 : index
      %c0_15 = arith.constant 0 : index
      %31 = vector.load %arg6[%c0_14, %c0_15] : memref<8x128xf32, #tpu.memory_space<vmem>>, vector<8x128xf32>
      %32 = arith.addf %31, %24 : vector<8x128xf32>
      %c0_16 = arith.constant 0 : index
      %c0_17 = arith.constant 0 : index
      %33 = vector.load %arg6[%c0_16, %c0_17] : memref<8x128xf32, #tpu.memory_space<vmem>>, vector<8x128xf32>
      tpu.vector_store %arg6[%c0_16, %c0_17], %32 {strides = array<i32>} : memref<8x128xf32, #tpu.memory_space<vmem>>, vector<8x128xf32>,
    } else {
    }
    return
  }
  func.func @transform_0(%arg0: i32, %arg1: i32) -> (i32, i32, i32) {
    %c0_i32 = arith.constant 0 : i32
    %c0_i32_0 = arith.constant 0 : i32
    return %arg0, %arg1, %c0_i32 : i32, i32, i32
  }
  func.func @transform_1(%arg0: i32, %arg1: i32) -> (i32, i32) {
    %c0_i32 = arith.constant 0 : i32
    %c0_i32_0 = arith.constant 0 : i32
    %c0_i32_1 = arith.constant 0 : i32
    return %c0_i32, %c0_i32_0 : i32, i32
  }
  func.func @transform_2(%arg0: i32, %arg1: i32) -> (i32, i32) {
    %c0_i32 = arith.constant 0 : i32
    %c0_i32_0 = arith.constant 0 : i32
    %c0_i32_1 = arith.constant 0 : i32
    return %c0_i32, %c0_i32_0 : i32, i32
  }
  func.func @transform_3(%arg0: i32, %arg1: i32) -> (i32, i32) {
    %c0_i32 = arith.constant 0 : i32
    %c0_i32_0 = arith.constant 0 : i32
    %c0_i32_1 = arith.constant 0 : i32
    return %c0_i32, %c0_i32_0 : i32, i32
  }
  func.func @transform_4(%arg0: i32, %arg1: i32) -> (i32, i32) {
    %c0_i32 = arith.constant 0 : i32
    %c0_i32_0 = arith.constant 0 : i32
    return %arg0, %c0_i32 : i32, i32
  }
}

</mosaic_0001>

<bundles_post_ra>
// kernel: tpu_custom_call.1
= control target key start
LH: loop header
LB: loop body
LE: loop exit
PB: predicated region body
PF: predicated region fallthrough
CT: control target
= control target key end

     0   :  { %9 = vsyncpa [#allocation3], 0  ;;  %s596_s0 = inlined_call_operand.hbm [shape: f32[2,8,32], index: 0, kind: input, shape index: {}]   ;;  %s597_s1 = inlined_call_operand.hbm [shape: bf16[32,128], index: 1, kind: input, shape index: {}]   ;;  %s598_s2 = inlined_call_operand.vmem [shape: f32[1,128], index: 2, kind: input, shape index: {}]   ;;  %s599_s3 = inlined_call_operand.vmem [shape: f32[1,128], index: 3, kind: input, shape index: {}]   ;;  %s600_s4 = inlined_call_operand.hbm [shape: f32[2,128], index: 4, kind: output, shape index: {}]  }
   0x1   :  { %10 = vsyncpa [#allocation6], 0 }
   0x2   :  { %11 = vsyncpa [#allocation4], 0 }
   0x3   :  { %16 = vsyncadd [#allocation3], 768  ;;  %s516_s15 = smov [#allocation2]   ;;  %s444_s19 = scalar_lea.hbm %s596_s0, 256 }
   0x4   :  { %s17_s16 = sshll.u32 %s516_s15, 4  ;;  %p445_p0 = scmp.ne.s32.totalorder %s596_s0, %s444_s19  ;;  %s18_s16 = int_to_ptr.vmem [resolvable:$true] %s17_s16 }
   0x5   :  { %p448_p1 = scmp.lt.u32.totalorder %s444_s19, %s596_s0 }
   0x7   :  { %p450_p2 = pnand %p448_p1, %p445_p0 }
   0x9   :  { %453 = shalt.err (!%p450_p2)
}
   0xa   :  { %s454_s24 = scalar_lea.vmem %s18_s16, 256  ;;  %s458_s25 = scalar_lea.vmem %s18_s16, 1024 }
   0xb   :  { %p455_p3 = scmp.ne.s32.totalorder %s18_s16, %s454_s24  ;;  %p459_p4 = scmp.lt.s32.totalorder %s18_s16, %s18_s16 }
   0xc   :  { %p460_p5 = scmp.lt.s32.totalorder %s458_s25, %s454_s24 }
   0xe   :  { %p461_p6 = por %p460_p5, %p459_p4 }
  0x10   :  { %p462_p7 = pnand %p461_p6, %p455_p3 }
  0x12   :  { %465 = shalt.err (!%p462_p7)
}
  0x13   :  { %s517_s26 = smov 128   ;;  %s518_s27 = smov 8  }
  0x14   :  { %23 = dma.hbm_to_vmem [thread:$0]  %s596_s0, 256, %s18_s16, [#allocation3], %s517_s26, %s517_s26, %s518_s27  }
  0x15   :  { %s519_s30 = smov [#allocation5]   ;;  %s466_s8 = scalar_lea.hbm %s597_s1, 256 }
  0x16   :  { %s29_s5 = sshll.u32 %s519_s30, 4  ;;  %p467_p8 = scmp.ne.s32.totalorder %s597_s1, %s466_s8  ;;  %s30_s5 = int_to_ptr.vmem [resolvable:$true] %s29_s5 }
  0x17   :  { %p470_p9 = scmp.lt.u32.totalorder %s466_s8, %s597_s1 }
  0x19   :  { %p472_p10 = pnand %p470_p9, %p467_p8 }
  0x1b   :  { %475 = shalt.err (!%p472_p10)
}
  0x1c   :  { %s476_s13 = scalar_lea.vmem %s30_s5, 256  ;;  %p481_p12 = scmp.lt.s32.totalorder %s30_s5, %s30_s5 }
  0x1d   :  { %p477_p11 = scmp.ne.s32.totalorder %s30_s5, %s476_s13  ;;  %p482_p13 = scmp.lt.s32.totalorder %s476_s13, %s476_s13 }
  0x1f   :  { %p483_p0 = por %p482_p13, %p481_p12 }
  0x21   :  { %p484_p1 = pnand %p483_p0, %p477_p11 }
  0x23   :  { %487 = shalt.err (!%p484_p1)
}
  0x24   :  { %s520_s0 = smov 64   ;;  %s521_s14 = smov 4  }
  0x25   :  { %35 = dma.hbm_to_vmem [thread:$0]  %s597_s1, 256, %s30_s5, [#allocation6], %s520_s0, %s520_s0, %s521_s14  }
  0x26   :  { %510 = dma.done.wait [#allocation3], 1024  }
  0x27   :  { %511 = vsyncadd [#allocation3], 4294966272 }
  0x28   :  { %512 = dma.done.wait [#allocation6], 256  }
  0x29   :  { %513 = vsyncadd [#allocation6], 4294967040  ;;  %v418_v0 = vld [vmem:[#allocation5] sm:$0xff]   ;;  %v419_v1 = vld [vmem:[#allocation5 + $0x8] sm:$0xff]   ;;  %vm82_vm0 = vcmask 261120   ;;  %vm315_vm1 = vcmask 1041409  }
  0x2a   :  { %393 = vmatprep.subr.bf16.mxu0 %v418_v0  ;;  %405 = vmatprep.subr.bf16.mxu1 %v418_v0  ;;  %v47_v2 = vld [vmem:[#allocation2] sm:$0xff]  ;;  %v48_v3 = vld [vmem:[#allocation2 + $0x8] sm:$0xff]  ;;  %v49_v4 = vld [vmem:[#allocation2 + $0x10] sm:$0xff]  ;;  %vm317_vm2 = vcmask 1042434   ;;  %vm319_vm3 = vcmask 1043459   ;;  %vm321_vm4 = vcmask 1044484  }
  0x2b   :  { %394 = vmatpush3.bf16.msra.mxu0 %v418_v0  ;;  %407 = vmatpush3.bf16.msra.mxu1 %v418_v0  ;;  %v55_v5 = vpack.c.bf16 %v48_v3, %v47_v2  ;;  %v50_v6 = vld [vmem:[#allocation2 + $0x18] sm:$0xff]  ;;  %v51_v7 = vld [vmem:[#allocation2 + $0x20] sm:$0xff]  ;;  %v52_v8 = vld [vmem:[#allocation2 + $0x28] sm:$0xff]  ;;  %vm323_vm5 = vcmask 1045509   ;;  %vm325_vm6 = vcmask 1046534   ;;  %vm327_vm7 = vcmask 1047559  }
  0x2c   :  { %395 = vmatprep.subr.bf16.mxu0 %v419_v1  ;;  %406 = vmatprep.subr.bf16.mxu1 %v419_v1  ;;  %v57_v9 = vpack.c.bf16 %v52_v8, %v51_v7  ;;  %v53_v10 = vld [vmem:[#allocation2 + $0x30] sm:$0xff]  ;;  %v54_v11 = vld [vmem:[#allocation2 + $0x38] sm:$0xff]  ;;  %v56_v12 = vpack.c.bf16 %v50_v6, %v49_v4  ;;  %v379_v14 = vld [vmem:[%s598_s2] ss:$0 sm:$0xff] }
  0x2d   :  { %397 = vmatprep.mubr.msk.bf16.mxu0 %vm82_vm0, %v55_v5  ;;  %v58_v13 = vpack.c.bf16 %v54_v11, %v53_v10  ;;  %v386_v17 = vld [vmem:[%s599_s3] ss:$0 sm:$0xff] }
  0x2e   :  { %401 = vmatprep.mubr.msk.bf16.mxu1 %vm82_vm0, %v57_v9 }
  0x2f   :  { %396 = vmatpush3.bf16.msra.mxu0 %v419_v1  ;;  %408 = vmatpush3.bf16.msra.mxu1 %v419_v1 }
  0x32   :  { %398 = vmatmul.mubr.msk.bf16.vlgmr.msra.gmra.mrb[0].mxu0 %vm82_vm0, %v56_v12  ;;  %402 = vmatmul.mubr.msk.bf16.vlgmr.msra.gmra.mrb[0].mxu1 %vm82_vm0, %v58_v13 }
 0x105   :  { %v399_v15 = vpop.f32.mrb[0].mxu0  ;;  %v403_v16 = vpop.f32.mrb[0].mxu1 }
 0x106   :  { %v138_v18 = vadd.f32 %v399_v15, %v379_v14  ;;  %v129_v19 = vpop.f32.mrb[1].mxu0  ;;  %v145_v20 = vpop.f32.mrb[1].mxu1  ;;  %v154_v37 = vadd.f32 %v403_v16, %v379_v14 }
 0x107   :  { %v130_v21 = vadd.f32 %v379_v14, %v129_v19  ;;  %v400_v22 = vpop.f32.mrb[2].mxu0  ;;  %v404_v23 = vpop.f32.mrb[2].mxu1  ;;  %v146_v31 = vadd.f32 %v379_v14, %v145_v20 }
 0x108   :  { %v141_v24 = vadd.f32 %v400_v22, %v379_v14  ;;  %v132_v25 = vpop.f32.mrb[3].mxu0  ;;  %v169_v26 = vadd.f32 %v386_v17, %v138_v18  ;;  %v148_v27 = vpop.f32.mrb[3].mxu1  ;;  %v157_v36 = vadd.f32 %v404_v23, %v379_v14  ;;  %v173_v39 = vadd.f32 %v386_v17, %v154_v37 }
 0x109   :  { %v133_v28 = vadd.f32 %v379_v14, %v132_v25  ;;  %v167_v29 = vadd.f32 %v386_v17, %v130_v21  ;;  %v149_v30 = vadd.f32 %v379_v14, %v148_v27  ;;  %v171_v35 = vadd.f32 %v386_v17, %v146_v31 }
 0x10a   :  { %179 = vmax.xlane.f32.xlu1 %v169_v26  ;;  %v170_v32 = vadd.f32 %v386_v17, %v141_v24  ;;  %v174_v38 = vadd.f32 %v386_v17, %v157_v36 }
 0x10b   :  { %175 = vmax.xlane.f32.xlu0 %v167_v29  ;;  %v168_v33 = vadd.f32 %v386_v17, %v133_v28  ;;  %v172_v34 = vadd.f32 %v386_v17, %v149_v30 }
 0x10e   :  { %181 = vmax.xlane.f32.xlu1 %v170_v32 }
 0x10f   :  { %177 = vmax.xlane.f32.xlu0 %v168_v33 }
 0x112   :  { %185 = vmax.xlane.f32.xlu1 %v172_v34 }
 0x113   :  { %183 = vmax.xlane.f32.xlu0 %v171_v35 }
 0x116   :  { %189 = vmax.xlane.f32.xlu1 %v174_v38 }
 0x117   :  { %187 = vmax.xlane.f32.xlu0 %v173_v39 }
 0x197   :  { %v180_v40 = vpop.xlane.xlu1 %179 }
 0x198   :  { %v176_v41 = vpop.xlane.xlu0 %175  ;;  %v193_v43 = vsub.f32 %v169_v26, %v180_v40 }
 0x199   :  { %v191_v46 = vsub.f32 %v167_v29, %v176_v41 }
 0x19b   :  { %v182_v42 = vpop.xlane.xlu1 %181 }
 0x19c   :  { %v194_v44 = vsub.f32 %v170_v32, %v182_v42  ;;  %v178_v45 = vpop.xlane.xlu0 %177 }
 0x19d   :  { %v192_v47 = vsub.f32 %v168_v33, %v178_v45 }
 0x19e   :  { %v200_v48 = vpack.c.bf16 %v194_v44, %v193_v43 }
 0x19f   :  { %v199_v49 = vpack.c.bf16 %v192_v47, %v191_v46  ;;  %v186_v50 = vpop.xlane.xlu1 %185 }
 0x1a0   :  { %v207_v51 = vmul.bf16 1069105081, %v200_v48  ;;  %v196_v52 = vsub.f32 %v172_v34, %v186_v50  ;;  %v184_v53 = vpop.xlane.xlu0 %183 }
 0x1a1   :  { %v204_v54 = vmul.bf16 1069105081, %v199_v49  ;;  %v195_v55 = vsub.f32 %v171_v35, %v184_v53 }
 0x1a2   :  { %420 = vpow.bf16 %v207_v51 }
 0x1a3   :  { %v201_v56 = vpack.c.bf16 %v196_v52, %v195_v55  ;;  %v190_v57 = vpop.xlane.xlu1 %189  ;;  %422 = vpow.bf16 %v204_v54 }
 0x1a4   :  { %v198_v58 = vsub.f32 %v174_v38, %v190_v57  ;;  %v188_v59 = vpop.xlane.xlu0 %187 }
 0x1a5   :  { %v210_v60 = vmul.bf16 1069105081, %v201_v56  ;;  %v197_v61 = vsub.f32 %v173_v39, %v188_v59 }
 0x1a7   :  { %v202_v62 = vpack.c.bf16 %v198_v58, %v197_v61  ;;  %424 = vpow.bf16 %v210_v60 }
 0x1a9   :  { %v213_v63 = vmul.bf16 1069105081, %v202_v62 }
 0x1ab   :  { %426 = vpow.bf16 %v213_v63 }
 0x1ad   :  { %v421_v0 = vpop.eup %420 }
 0x1ae   :  { %v218_v1 = vunpack.c.h.bf16 %v421_v0  ;;  %v217_v2 = vunpack.c.l.bf16 %v421_v0  ;;  %v423_v3 = vpop.eup %422 }
 0x1af   :  { %v216_v4 = vunpack.c.h.bf16 %v423_v3  ;;  %v215_v5 = vunpack.c.l.bf16 %v423_v3 }
 0x1b0   :  { %229 = vadd.xlane.f32.xlu1 %v218_v1  ;;  %227 = vadd.xlane.f32.xlu0 %v217_v2 }
 0x1b2   :  { %v425_v6 = vpop.eup %424 }
 0x1b3   :  { %v220_v7 = vunpack.c.h.bf16 %v425_v6  ;;  %v219_v8 = vunpack.c.l.bf16 %v425_v6 }
 0x1b4   :  { %225 = vadd.xlane.f32.xlu1 %v216_v4  ;;  %223 = vadd.xlane.f32.xlu0 %v215_v5 }
 0x1b6   :  { %v427_v9 = vpop.eup %426 }
 0x1b7   :  { %v222_v10 = vunpack.c.h.bf16 %v427_v9  ;;  %v221_v11 = vunpack.c.l.bf16 %v427_v9 }
 0x1b8   :  { %233 = vadd.xlane.f32.xlu1 %v220_v7  ;;  %231 = vadd.xlane.f32.xlu0 %v219_v8 }
 0x1bc   :  { %237 = vadd.xlane.f32.xlu1 %v222_v10  ;;  %235 = vadd.xlane.f32.xlu0 %v221_v11 }
 0x23d   :  { %v230_v12 = vpop.xlane.xlu1 %229  ;;  %v228_v13 = vpop.xlane.xlu0 %227 }
 0x23e   :  { %428 = vrcp.f32 %v230_v12 }
 0x23f   :  { %430 = vrcp.f32 %v228_v13 }
 0x241   :  { %v226_v14 = vpop.xlane.xlu1 %225  ;;  %v224_v15 = vpop.xlane.xlu0 %223 }
 0x242   :  { %432 = vrcp.f32 %v226_v14 }
 0x243   :  { %434 = vrcp.f32 %v224_v15 }
 0x245   :  { %v234_v16 = vpop.xlane.xlu1 %233  ;;  %v232_v17 = vpop.xlane.xlu0 %231 }
 0x246   :  { %436 = vrcp.f32 %v234_v16 }
 0x247   :  { %438 = vrcp.f32 %v232_v17 }
 0x248   :  { %v429_v18 = vpop.eup %428 }
 0x249   :  { %v431_v19 = vpop.eup %430  ;;  %v250_v20 = vmul.f32 %v429_v18, %v218_v1  ;;  %v238_v21 = vpop.xlane.xlu1 %237 }
 0x24a   :  { %v236_v22 = vpop.xlane.xlu0 %235  ;;  %v249_v23 = vmul.f32 %v431_v19, %v217_v2  ;;  %440 = vrcp.f32 %v238_v21 }
 0x24b   :  { %v273_v24 = vrot.slane %v250_v20, 4  ;;  %442 = vrcp.f32 %v236_v22 }
 0x24c   :  { %v433_v25 = vpop.eup %432  ;;  %v267_v26 = vrot.slane %v249_v23, 4 }
 0x24d   :  { %v435_v27 = vpop.eup %434  ;;  %v274_v28 = vadd.f32 %v273_v24, %v250_v20  ;;  %v248_v29 = vmul.f32 %v433_v25, %v216_v4 }
 0x24e   :  { %v268_v30 = vadd.f32 %v267_v26, %v249_v23  ;;  %v247_v31 = vmul.f32 %v435_v27, %v215_v5 }
 0x24f   :  { %v261_v32 = vrot.slane %v248_v29, 4  ;;  %v275_v34 = vrot.slane %v274_v28, 2 }
 0x250   :  { %v437_v33 = vpop.eup %436  ;;  %v269_v35 = vrot.slane %v268_v30, 2  ;;  %v255_v36 = vrot.slane %v247_v31, 4 }
 0x251   :  { %v439_v37 = vpop.eup %438  ;;  %v262_v38 = vadd.f32 %v261_v32, %v248_v29  ;;  %v252_v39 = vmul.f32 %v437_v33, %v220_v7  ;;  %v276_v46 = vadd.f32 %v275_v34, %v274_v28 }
 0x252   :  { %v256_v40 = vadd.f32 %v255_v36, %v247_v31  ;;  %v251_v41 = vmul.f32 %v439_v37, %v219_v8  ;;  %v270_v42 = vadd.f32 %v269_v35, %v268_v30 }
 0x253   :  { %v263_v43 = vrot.slane %v262_v38, 2  ;;  %v285_v44 = vrot.slane %v252_v39, 4  ;;  %v277_v60 = vrot.slane %v276_v46, 1 }
 0x254   :  { %v441_v45 = vpop.eup %440  ;;  %v257_v47 = vrot.slane %v256_v40, 2  ;;  %v279_v48 = vrot.slane %v251_v41, 4  ;;  %v271_v56 = vrot.slane %v270_v42, 1 }
 0x255   :  { %v443_v49 = vpop.eup %442  ;;  %v264_v50 = vadd.f32 %v263_v43, %v262_v38  ;;  %v286_v51 = vadd.f32 %v285_v44, %v252_v39  ;;  %v254_v52 = vmul.f32 %v441_v45, %v222_v10  ;;  %v278_v9 = vadd.f32 %v277_v60, %v276_v46 }
 0x256   :  { %v258_v53 = vadd.f32 %v257_v47, %v256_v40  ;;  %v280_v54 = vadd.f32 %v279_v48, %v251_v41  ;;  %v253_v55 = vmul.f32 %v443_v49, %v221_v11  ;;  %v272_v6 = vadd.f32 %v271_v56, %v270_v42 }
 0x257   :  { %v265_v57 = vrot.slane %v264_v50, 1  ;;  %v287_v58 = vrot.slane %v286_v51, 2  ;;  %v297_v59 = vrot.slane %v254_v52, 4 }
 0x258   :  { %v259_v61 = vrot.slane %v258_v53, 1  ;;  %v281_v62 = vrot.slane %v280_v54, 2  ;;  %v291_v63 = vrot.slane %v253_v55, 4 }
 0x259   :  { %v266_v0 = vadd.f32 %v265_v57, %v264_v50  ;;  %v288_v1 = vadd.f32 %v287_v58, %v286_v51  ;;  %v298_v2 = vadd.f32 %v297_v59, %v254_v52 }
 0x25a   :  { %v260_v3 = vadd.f32 %v259_v61, %v258_v53  ;;  %v282_v4 = vadd.f32 %v281_v62, %v280_v54  ;;  %v292_v5 = vadd.f32 %v291_v63, %v253_v55 }
 0x25b   :  { %v289_v7 = vrot.slane %v288_v1, 1  ;;  %v299_v8 = vrot.slane %v298_v2, 2 }
 0x25c   :  { %v316_v10 = vsel %vm315_vm1, %v266_v0, %v260_v3  ;;  %v283_v11 = vrot.slane %v282_v4, 1  ;;  %v293_v12 = vrot.slane %v292_v5, 2 }
 0x25d   :  { %v318_v13 = vsel %vm317_vm2, %v272_v6, %v316_v10  ;;  %v300_v14 = vadd.f32 %v299_v8, %v298_v2  ;;  %v290_v18 = vadd.f32 %v289_v7, %v288_v1 }
 0x25e   :  { %v320_v15 = vsel %vm319_vm3, %v278_v9, %v318_v13  ;;  %v284_v16 = vadd.f32 %v283_v11, %v282_v4  ;;  %v294_v17 = vadd.f32 %v293_v12, %v292_v5 }
 0x25f   :  { %v301_v19 = vrot.slane %v300_v14, 1 }
 0x260   :  { %v322_v20 = vsel %vm321_vm4, %v284_v16, %v320_v15  ;;  %v295_v21 = vrot.slane %v294_v17, 1 }
 0x261   :  { %v302_v22 = vadd.f32 %v301_v19, %v300_v14  ;;  %v324_v24 = vsel %vm323_vm5, %v290_v18, %v322_v20 }
 0x262   :  { %v296_v23 = vadd.f32 %v295_v21, %v294_v17 }
 0x264   :  { %v326_v25 = vsel %vm325_vm6, %v296_v23, %v324_v24 }
 0x265   :  { %v328_v26 = vsel %vm327_vm7, %v302_v22, %v326_v25 }
 0x266   :  { %330 = vst [vmem:[#allocation7] sm:$0xff] %v328_v26 }
 0x267   :  { %365 = vsyncadd [#allocation4], 96  ;;  %s522_s2 = smov [#allocation7]  }
 0x268   :  { %s366_s3 = sshll.u32 %s522_s2, 4  ;;  %s367_s3 = int_to_ptr.vmem [resolvable:$true] %s366_s3 }
 0x269   :  { %s488_s20 = scalar_lea.vmem %s367_s3, 32  ;;  %s492_s21 = scalar_lea.vmem %s367_s3, 128 }
 0x26a   :  { %p489_p2 = scmp.ne.s32.totalorder %s367_s3, %s488_s20  ;;  %p493_p3 = scmp.lt.s32.totalorder %s367_s3, %s367_s3 }
 0x26b   :  { %p494_p4 = scmp.lt.s32.totalorder %s492_s21, %s488_s20 }
 0x26d   :  { %p495_p5 = por %p494_p4, %p493_p3 }
 0x26f   :  { %p496_p6 = pnand %p495_p5, %p489_p2 }
 0x271   :  { %499 = shalt.err (!%p496_p6)
}
 0x272   :  { %s500_s24 = scalar_lea.hbm %s600_s4, 32 }
 0x273   :  { %p501_p7 = scmp.ne.s32.totalorder %s600_s4, %s500_s24  ;;  %p504_p8 = scmp.lt.u32.totalorder %s500_s24, %s600_s4 }
 0x275   :  { %p506_p9 = pnand %p504_p8, %p501_p7 }
 0x277   :  { %509 = shalt.err (!%p506_p9)
}
 0x278   :  { %s523_s29 = smov 32   ;;  %s524_s30 = smov 2  }
 0x279   :  { %372 = dma.vmem_to_hbm [thread:$0]  %s367_s3, 32, %s600_s4, [#allocation4], %s523_s29, %s523_s29, %s524_s30  }
 0x27a   :  { %514 = dma.done.wait [#allocation4], 128  }
 0x27b   :  { %515 = vsyncadd [#allocation4], 4294967168 }
 0x27c   :  { %376 = vsyncpa [#allocation3], 1 }
 0x27d   :  { %377 = vsyncpa [#allocation6], 1 }
 0x27e   :  { %378 = vsyncpa [#allocation4], 1 }

</bundles_post_ra>
